<compile_context>
chip_gen: v7x
topology: tpu7x:2x2x1
jax: 0.10.0
libtpu: 0.0.40
codegen_flags: <defaults>
</compile_context>

<pallas_src>
import jax
import jax.numpy as jnp
from jax import lax
from jax.experimental import pallas as pl
from jax.experimental.pallas import tpu as pltpu

EPS = 1e-5
CONV_DTYPE = jnp.bfloat16   # MXU operand dtype (accumulation stays f32)


def basic_block_kernel(x_ref, band1_ref, band2_ref, g1_ref, b1_ref,
                       g2_ref, b2_ref, fold_ref, bcast_ref, o_ref):
    """Fused conv3x3+bn1+relu -> conv3x3+bn2 -> +residual -> relu.

    Layouts (lane index l = n*(C*W) + c*W + w, L = N*C*W):
      x_ref      : (H, L)     f32   packed activations (all N images per row)
      bandX_ref  : (3L, L)    bf16  stacked banded conv weights (ky taps
                                    stacked on K; block-diagonal over N)
      gX/bX_ref  : (1, C)     f32   BatchNorm affine params
      fold_ref   : (L, C)     f32   lane -> channel reduction matrix (0/1)
      bcast_ref  : (C, L)     f32   channel -> lane broadcast matrix (0/1)
      o_ref      : (H, L)     f32   output
    """
    H, L = x_ref.shape
    C = fold_ref.shape[1]
    inv_count = 1.0 / float(H * (L // C))          # 1 / (N*H*W) per channel

    fold = fold_ref[...]                           # (L, C)
    bcast = bcast_ref[...]                         # (C, L)
    row = lax.broadcasted_iota(jnp.int32, (H, L), 0)

    def taps(v):
        # +/-1 H shifts on the XLU (sublane rotate); zero the image-boundary
        # rows (SAME padding along H).  W padding lives inside the band weight.
        up = jnp.where(row == 0, 0.0, pltpu.roll(v, 1, axis=0))        # x[h-1]
        down = jnp.where(row == H - 1, 0.0, pltpu.roll(v, H - 1, axis=0))  # x[h+1]
        return jnp.concatenate([up, v, down], axis=-1)                 # (H, 3L)

    def conv_bn(v, band_ref, g_ref, b_ref):
        # One lane-dense MXU matmul for the whole 3x3 conv (single bf16 cast).
        a = taps(v).astype(CONV_DTYPE)                                  # (H, 3L)
        acc = jnp.dot(a, band_ref[...],
                      preferred_element_type=jnp.float32)               # (H, L) f32

        # Training-mode BatchNorm: biased batch variance via one sum / sumsq
        # pass; per-channel fold & broadcast as two tiny fused matmuls.
        s1 = jnp.sum(acc, axis=0, keepdims=True)                        # (1, L)
        s2 = jnp.sum(acc * acc, axis=0, keepdims=True)                  # (1, L)
        stats = jnp.dot(jnp.concatenate([s1, s2], axis=0), fold,
                        preferred_element_type=jnp.float32) * inv_count  # (2, C)
        mean_c = stats[0:1, :]
        var_c = jnp.maximum(stats[1:2, :] - mean_c * mean_c, 0.0)       # clamp
        scale_c = g_ref[...] * lax.rsqrt(var_c + EPS)                   # (1, C)
        shift_c = b_ref[...] - mean_c * scale_c                         # (1, C)
        ss = jnp.dot(jnp.concatenate([scale_c, shift_c], axis=0), bcast,
                     preferred_element_type=jnp.float32)                 # (2, L)
        return acc * ss[0:1, :] + ss[1:2, :]                            # (H, L)

    xv = x_ref[...]                                                     # f32
    y1 = jnp.maximum(conv_bn(xv, band1_ref, g1_ref, b1_ref), 0.0)
    y2 = conv_bn(y1, band2_ref, g2_ref, b2_ref) + xv                    # residual
    o_ref[...] = jnp.maximum(y2, 0.0).astype(o_ref.dtype)


def _band_weights_packed(w_hwio, N, W):
    """Fold kx taps + W-direction SAME padding of a 3x3 conv into banded
    matrices, block-diagonal over the N images packed along lanes, and stack
    the 3 ky taps along the contraction dim.

    Returns (3*L, L) with L = N*Cin*W (Cin == Cout here), such that
      concat([x[h-1], x[h], x[h+1]], lanes) @ band  ==  SAME conv3x3 row h.
    """
    K, _, Cin, Cout = w_hwio.shape
    wi = jnp.arange(W)[:, None]            # input W position
    wo = jnp.arange(W)[None, :]            # output W position
    kx = wi - wo + 1                       # (W, W)
    valid = (kx >= 0) & (kx < K)
    kxc = jnp.clip(kx, 0, K - 1)
    eye_n = jnp.eye(N, dtype=w_hwio.dtype)
    bands = []
    for ky in range(K):
        t = w_hwio[ky][kxc]                                    # (W, W, Cin, Cout)
        t = jnp.where(valid[:, :, None, None], t, 0.0)
        # blk[ci*W + wi, co*W + wo] = w_hwio[ky, wi-wo+1, ci, co]
        blk = jnp.transpose(t, (2, 0, 3, 1)).reshape(Cin * W, Cout * W)
        bands.append(jnp.kron(eye_n, blk))                     # block-diag over N
    return jnp.concatenate(bands, axis=0)                      # (3L, L)


def prepare_block_params(w1_oihw, g1, b1, w2_oihw, g2, b2, N, W):
    """One-time (per layer) preprocessing of static parameters."""
    C = w1_oihw.shape[1]
    L = N * C * W
    w1_hwio = jnp.transpose(w1_oihw, (2, 3, 1, 0)).astype(jnp.float32)
    w2_hwio = jnp.transpose(w2_oihw, (2, 3, 1, 0)).astype(jnp.float32)
    band1 = _band_weights_packed(w1_hwio, N, W).astype(CONV_DTYPE)   # (3L, L)
    band2 = _band_weights_packed(w2_hwio, N, W).astype(CONV_DTYPE)
    # lane l = n*C*W + c*W + w  =>  channel(l) = (l // W) % C
    chan = (jnp.arange(L) // W) % C
    fold = (chan[:, None] == jnp.arange(C)[None, :]).astype(jnp.float32)  # (L, C)
    return dict(
        band1=band1, band2=band2,
        g1=g1.reshape(1, C).astype(jnp.float32),
        b1=b1.reshape(1, C).astype(jnp.float32),
        g2=g2.reshape(1, C).astype(jnp.float32),
        b2=b2.reshape(1, C).astype(jnp.float32),
        fold=fold, bcast=fold.T)


@jax.jit
def basic_block_forward(x_nchw, params):
    """Pallas BasicBlock forward.  x: (N, C, H, W) NCHW."""
    N, C, H, W = x_nchw.shape
    L = N * C * W
    # NCHW -> lane-packed layout (H, N*C*W); W stays the minor axis.
    # TODO(synk): a production ResNet would keep activations in this packed
    # layout between blocks so these two transposes amortize away.
    x_row = jnp.transpose(x_nchw.astype(jnp.float32), (2, 0, 1, 3)).reshape(H, L)

    out_row = pl.pallas_call(
        basic_block_kernel,
        out_shape=jax.ShapeDtypeStruct((H, L), jnp.float32),
        in_specs=[pl.BlockSpec(memory_space=pltpu.MemorySpace.VMEM)
                  for _ in range(9)],
        out_specs=pl.BlockSpec(memory_space=pltpu.MemorySpace.VMEM),
    )(x_row, params["band1"], params["band2"], params["g1"], params["b1"],
      params["g2"], params["b2"], params["fold"], params["bcast"])

    out = out_row.reshape(H, N, C, W)
    return jnp.transpose(out, (1, 2, 0, 3))                    # back to NCHW


def reference_forward(x_nchw, w1_oihw, g1, b1, w2_oihw, g2, b2):
    """Pure-JAX reference mirroring the kernel's bf16 MXU operands / f32 acc."""
    def conv(v, w):
        return lax.conv_general_dilated(
            v.astype(CONV_DTYPE), w.astype(CONV_DTYPE),
            window_strides=(1, 1), padding="SAME",
            dimension_numbers=("NCHW", "OIHW", "NCHW"),
            preferred_element_type=jnp.float32)

    def bn(v, g, b):
        mean = v.mean(axis=(0, 2, 3), keepdims=True)
        var = ((v - mean) ** 2).mean(axis=(0, 2, 3), keepdims=True)
        return ((v - mean) * lax.rsqrt(var + EPS) * g.reshape(1, -1, 1, 1)
                + b.reshape(1, -1, 1, 1))

    x = x_nchw.astype(jnp.float32)
    o = jnp.maximum(bn(conv(x, w1_oihw), g1, b1), 0.0)
    o = bn(conv(o, w2_oihw), g2, b2) + x
    return jnp.maximum(o, 0.0)


if __name__ == "__main__":
    # BasicBlock(inplanes=4, planes=4, stride=1, downsample=None)
    N, C, H, W = 2, 4, 16, 16
    key = jax.random.PRNGKey(0)
    kx_, kw1, kw2, kg1, kb1, kg2, kb2 = jax.random.split(key, 7)

    x = jax.random.normal(kx_, (N, C, H, W), jnp.float32)
    # Conv weights in PyTorch OIHW layout (Cout, Cin, 3, 3); bias=False.
    w1 = jax.random.normal(kw1, (C, C, 3, 3), jnp.float32) * 0.2
    w2 = jax.random.normal(kw2, (C, C, 3, 3), jnp.float32) * 0.2
    # BatchNorm affine params (randomized to exercise the scale/shift path).
    g1 = 1.0 + 0.1 * jax.random.normal(kg1, (C,), jnp.float32)
    b1 = 0.1 * jax.random.normal(kb1, (C,), jnp.float32)
    g2 = 1.0 + 0.1 * jax.random.normal(kg2, (C,), jnp.float32)
    b2 = 0.1 * jax.random.normal(kb2, (C,), jnp.float32)

    # Static per-layer preprocessing (banded weights, fold/bcast) done ONCE.
    params = prepare_block_params(w1, g1, b1, w2, g2, b2, N, W)
    params = jax.tree_util.tree_map(jax.block_until_ready, params)

    out = basic_block_forward(x, params)
    out = jax.block_until_ready(out)
    assert out.shape == (N, C, H, W)

    # Reference uses the same bf16 conv-operand precision as the kernel, so the
    # tolerance only absorbs accumulation-order / BN-formula differences.
    ref = reference_forward(x, w1, g1, b1, w2, g2, b2)
    err = float(jnp.max(jnp.abs(out - ref)))
    assert jnp.allclose(out, ref, rtol=1e-2, atol=1e-2), f"max abs err {err}"

    print("KERNEL_OK")
</pallas_src>

<mosaic_0001>
module attributes {stable_mosaic.version = 11 : i64} {
  func.func @basic_block_kernel(%arg0: memref<16x128xf32, #tpu.memory_space<vmem>>, %arg1: memref<384x128xbf16, #tpu.memory_space<vmem>>, %arg2: memref<384x128xbf16, #tpu.memory_space<vmem>>, %arg3: memref<1x4xf32, #tpu.memory_space<vmem>>, %arg4: memref<1x4xf32, #tpu.memory_space<vmem>>, %arg5: memref<1x4xf32, #tpu.memory_space<vmem>>, %arg6: memref<1x4xf32, #tpu.memory_space<vmem>>, %arg7: memref<128x4xf32, #tpu.memory_space<vmem>>, %arg8: memref<4x128xf32, #tpu.memory_space<vmem>>, %arg9: memref<16x128xf32, #tpu.memory_space<vmem>>) attributes {dimension_semantics = [], scalar_prefetch = 0 : i64, scratch_operands = 0 : i64, tpu.core_type = #tpu.core_type<tc>} {
    %c0 = arith.constant 0 : index
    %c0_0 = arith.constant 0 : index
    %0 = vector.load %arg7[%c0, %c0_0] : memref<128x4xf32, #tpu.memory_space<vmem>>, vector<128x4xf32>
    %c0_1 = arith.constant 0 : index
    %c0_2 = arith.constant 0 : index
    %1 = vector.load %arg8[%c0_1, %c0_2] : memref<4x128xf32, #tpu.memory_space<vmem>>, vector<4x128xf32>
    %2 = tpu.iota {dimensions = array<i32: 0>} : vector<16x128xi32>
    %c0_3 = arith.constant 0 : index
    %c0_4 = arith.constant 0 : index
    %3 = vector.load %arg0[%c0_3, %c0_4] : memref<16x128xf32, #tpu.memory_space<vmem>>, vector<16x128xf32>
    %c0_i32 = arith.constant 0 : i32
    %4 = vector.broadcast %c0_i32 : i32 to vector<16x128xi32>
    %5 = arith.cmpi eq, %2, %4 : vector<16x128xi32>
    %c1_i32 = arith.constant 1 : i32
    %6 = tpu.dynamic_rotate %3 by %c1_i32 dim 0 : vector<16x128xf32>, i32 -> vector<16x128xf32>
    %cst = arith.constant 0.000000e+00 : f32
    %7 = vector.broadcast %cst : f32 to vector<16x128xf32>
    %8 = arith.select %5, %7, %6 : vector<16x128xi1>, vector<16x128xf32>
    %c15_i32 = arith.constant 15 : i32
    %9 = vector.broadcast %c15_i32 : i32 to vector<16x128xi32>
    %10 = arith.cmpi eq, %2, %9 : vector<16x128xi32>
    %c15_i32_5 = arith.constant 15 : i32
    %11 = tpu.dynamic_rotate %3 by %c15_i32_5 dim 0 : vector<16x128xf32>, i32 -> vector<16x128xf32>
    %cst_6 = arith.constant 0.000000e+00 : f32
    %12 = vector.broadcast %cst_6 : f32 to vector<16x128xf32>
    %13 = arith.select %10, %12, %11 : vector<16x128xi1>, vector<16x128xf32>
    %14 = tpu.concatenate %8, %3, %13 in 1 : vector<16x128xf32>, vector<16x128xf32>, vector<16x128xf32> -> vector<16x384xf32>
    %15 = arith.truncf %14 : vector<16x384xf32> to vector<16x384xbf16>
    %c0_7 = arith.constant 0 : index
    %c0_8 = arith.constant 0 : index
    %16 = vector.load %arg1[%c0_7, %c0_8] : memref<384x128xbf16, #tpu.memory_space<vmem>>, vector<384x128xbf16>
    %cst_9 = arith.constant dense<0.000000e+00> : vector<16x128xf32>
    %17 = tpu.matmul %15, %16, %cst_9 {dimension_numbers = #tpu.dot_dimension_numbers<[1], [0], [0], [1], [0, 0, 1, 1], [], []>} : vector<16x384xbf16>, vector<384x128xbf16>, vector<16x128xf32> -> vector<16x128xf32>
    %cst_10 = arith.constant dense<0.000000e+00> : vector<128xf32>
    %18 = vector.multi_reduction <add>, %17, %cst_10 [0] : vector<16x128xf32> to vector<128xf32>
    %19 = vector.shape_cast %18 : vector<128xf32> to vector<1x128xf32>
    %20 = arith.mulf %17, %17 : vector<16x128xf32>
    %cst_11 = arith.constant dense<0.000000e+00> : vector<128xf32>
    %21 = vector.multi_reduction <add>, %20, %cst_11 [0] : vector<16x128xf32> to vector<128xf32>
    %22 = vector.shape_cast %21 : vector<128xf32> to vector<1x128xf32>
    %23 = tpu.concatenate %19, %22 in 0 : vector<1x128xf32>, vector<1x128xf32> -> vector<2x128xf32>
    %cst_12 = arith.constant dense<0.000000e+00> : vector<2x4xf32>
    %24 = tpu.matmul %23, %0, %cst_12 {dimension_numbers = #tpu.dot_dimension_numbers<[1], [0], [0], [1], [0, 0, 1, 1], [], []>} : vector<2x128xf32>, vector<128x4xf32>, vector<2x4xf32> -> vector<2x4xf32>
    %cst_13 = arith.constant 0.001953125 : f32
    %25 = vector.broadcast %cst_13 : f32 to vector<2x4xf32>
    %26 = arith.mulf %24, %25 : vector<2x4xf32>
    %27 = vector.extract_strided_slice %26 {offsets = [0, 0], sizes = [1, 4], strides = [1, 1]} : vector<2x4xf32> to vector<1x4xf32>
    %28 = vector.extract_strided_slice %26 {offsets = [1, 0], sizes = [1, 4], strides = [1, 1]} : vector<2x4xf32> to vector<1x4xf32>
    %29 = arith.mulf %27, %27 : vector<1x4xf32>
    %30 = arith.subf %28, %29 : vector<1x4xf32>
    %cst_14 = arith.constant 0.000000e+00 : f32
    %31 = vector.broadcast %cst_14 : f32 to vector<1x4xf32>
    %32 = arith.maximumf %30, %31 : vector<1x4xf32>
    %c0_15 = arith.constant 0 : index
    %c0_16 = arith.constant 0 : index
    %33 = vector.load %arg3[%c0_15, %c0_16] : memref<1x4xf32, #tpu.memory_space<vmem>>, vector<1x4xf32>
    %cst_17 = arith.constant 9.99999974E-6 : f32
    %34 = vector.broadcast %cst_17 : f32 to vector<1x4xf32>
    %35 = arith.addf %32, %34 : vector<1x4xf32>
    %36 = math.rsqrt %35 : vector<1x4xf32>
    %37 = arith.mulf %33, %36 : vector<1x4xf32>
    %c0_18 = arith.constant 0 : index
    %c0_19 = arith.constant 0 : index
    %38 = vector.load %arg4[%c0_18, %c0_19] : memref<1x4xf32, #tpu.memory_space<vmem>>, vector<1x4xf32>
    %39 = arith.mulf %27, %37 : vector<1x4xf32>
    %40 = arith.subf %38, %39 : vector<1x4xf32>
    %41 = tpu.concatenate %37, %40 in 0 : vector<1x4xf32>, vector<1x4xf32> -> vector<2x4xf32>
    %cst_20 = arith.constant dense<0.000000e+00> : vector<2x128xf32>
    %42 = tpu.matmul %41, %1, %cst_20 {dimension_numbers = #tpu.dot_dimension_numbers<[1], [0], [0], [1], [0, 0, 1, 1], [], []>} : vector<2x4xf32>, vector<4x128xf32>, vector<2x128xf32> -> vector<2x128xf32>
    %43 = vector.extract_strided_slice %42 {offsets = [0, 0], sizes = [1, 128], strides = [1, 1]} : vector<2x128xf32> to vector<1x128xf32>
    %44 = vector.broadcast %43 : vector<1x128xf32> to vector<16x128xf32>
    %45 = arith.mulf %17, %44 : vector<16x128xf32>
    %46 = vector.extract_strided_slice %42 {offsets = [1, 0], sizes = [1, 128], strides = [1, 1]} : vector<2x128xf32> to vector<1x128xf32>
    %47 = vector.broadcast %46 : vector<1x128xf32> to vector<16x128xf32>
    %48 = arith.addf %45, %47 : vector<16x128xf32>
    %cst_21 = arith.constant 0.000000e+00 : f32
    %49 = vector.broadcast %cst_21 : f32 to vector<16x128xf32>
    %50 = arith.maximumf %48, %49 : vector<16x128xf32>
    %c0_i32_22 = arith.constant 0 : i32
    %51 = vector.broadcast %c0_i32_22 : i32 to vector<16x128xi32>
    %52 = arith.cmpi eq, %2, %51 : vector<16x128xi32>
    %c1_i32_23 = arith.constant 1 : i32
    %53 = tpu.dynamic_rotate %50 by %c1_i32_23 dim 0 : vector<16x128xf32>, i32 -> vector<16x128xf32>
    %cst_24 = arith.constant 0.000000e+00 : f32
    %54 = vector.broadcast %cst_24 : f32 to vector<16x128xf32>
    %55 = arith.select %52, %54, %53 : vector<16x128xi1>, vector<16x128xf32>
    %c15_i32_25 = arith.constant 15 : i32
    %56 = vector.broadcast %c15_i32_25 : i32 to vector<16x128xi32>
    %57 = arith.cmpi eq, %2, %56 : vector<16x128xi32>
    %c15_i32_26 = arith.constant 15 : i32
    %58 = tpu.dynamic_rotate %50 by %c15_i32_26 dim 0 : vector<16x128xf32>, i32 -> vector<16x128xf32>
    %cst_27 = arith.constant 0.000000e+00 : f32
    %59 = vector.broadcast %cst_27 : f32 to vector<16x128xf32>
    %60 = arith.select %57, %59, %58 : vector<16x128xi1>, vector<16x128xf32>
    %61 = tpu.concatenate %55, %50, %60 in 1 : vector<16x128xf32>, vector<16x128xf32>, vector<16x128xf32> -> vector<16x384xf32>
    %62 = arith.truncf %61 : vector<16x384xf32> to vector<16x384xbf16>
    %c0_28 = arith.constant 0 : index
    %c0_29 = arith.constant 0 : index
    %63 = vector.load %arg2[%c0_28, %c0_29] : memref<384x128xbf16, #tpu.memory_space<vmem>>, vector<384x128xbf16>
    %cst_30 = arith.constant dense<0.000000e+00> : vector<16x128xf32>
    %64 = tpu.matmul %62, %63, %cst_30 {dimension_numbers = #tpu.dot_dimension_numbers<[1], [0], [0], [1], [0, 0, 1, 1], [], []>} : vector<16x384xbf16>, vector<384x128xbf16>, vector<16x128xf32> -> vector<16x128xf32>
    %cst_31 = arith.constant dense<0.000000e+00> : vector<128xf32>
    %65 = vector.multi_reduction <add>, %64, %cst_31 [0] : vector<16x128xf32> to vector<128xf32>
    %66 = vector.shape_cast %65 : vector<128xf32> to vector<1x128xf32>
    %67 = arith.mulf %64, %64 : vector<16x128xf32>
    %cst_32 = arith.constant dense<0.000000e+00> : vector<128xf32>
    %68 = vector.multi_reduction <add>, %67, %cst_32 [0] : vector<16x128xf32> to vector<128xf32>
    %69 = vector.shape_cast %68 : vector<128xf32> to vector<1x128xf32>
    %70 = tpu.concatenate %66, %69 in 0 : vector<1x128xf32>, vector<1x128xf32> -> vector<2x128xf32>
    %cst_33 = arith.constant dense<0.000000e+00> : vector<2x4xf32>
    %71 = tpu.matmul %70, %0, %cst_33 {dimension_numbers = #tpu.dot_dimension_numbers<[1], [0], [0], [1], [0, 0, 1, 1], [], []>} : vector<2x128xf32>, vector<128x4xf32>, vector<2x4xf32> -> vector<2x4xf32>
    %cst_34 = arith.constant 0.001953125 : f32
    %72 = vector.broadcast %cst_34 : f32 to vector<2x4xf32>
    %73 = arith.mulf %71, %72 : vector<2x4xf32>
    %74 = vector.extract_strided_slice %73 {offsets = [0, 0], sizes = [1, 4], strides = [1, 1]} : vector<2x4xf32> to vector<1x4xf32>
    %75 = vector.extract_strided_slice %73 {offsets = [1, 0], sizes = [1, 4], strides = [1, 1]} : vector<2x4xf32> to vector<1x4xf32>
    %76 = arith.mulf %74, %74 : vector<1x4xf32>
    %77 = arith.subf %75, %76 : vector<1x4xf32>
    %cst_35 = arith.constant 0.000000e+00 : f32
    %78 = vector.broadcast %cst_35 : f32 to vector<1x4xf32>
    %79 = arith.maximumf %77, %78 : vector<1x4xf32>
    %c0_36 = arith.constant 0 : index
    %c0_37 = arith.constant 0 : index
    %80 = vector.load %arg5[%c0_36, %c0_37] : memref<1x4xf32, #tpu.memory_space<vmem>>, vector<1x4xf32>
    %cst_38 = arith.constant 9.99999974E-6 : f32
    %81 = vector.broadcast %cst_38 : f32 to vector<1x4xf32>
    %82 = arith.addf %79, %81 : vector<1x4xf32>
    %83 = math.rsqrt %82 : vector<1x4xf32>
    %84 = arith.mulf %80, %83 : vector<1x4xf32>
    %c0_39 = arith.constant 0 : index
    %c0_40 = arith.constant 0 : index
    %85 = vector.load %arg6[%c0_39, %c0_40] : memref<1x4xf32, #tpu.memory_space<vmem>>, vector<1x4xf32>
    %86 = arith.mulf %74, %84 : vector<1x4xf32>
    %87 = arith.subf %85, %86 : vector<1x4xf32>
    %88 = tpu.concatenate %84, %87 in 0 : vector<1x4xf32>, vector<1x4xf32> -> vector<2x4xf32>
    %cst_41 = arith.constant dense<0.000000e+00> : vector<2x128xf32>
    %89 = tpu.matmul %88, %1, %cst_41 {dimension_numbers = #tpu.dot_dimension_numbers<[1], [0], [0], [1], [0, 0, 1, 1], [], []>} : vector<2x4xf32>, vector<4x128xf32>, vector<2x128xf32> -> vector<2x128xf32>
    %90 = vector.extract_strided_slice %89 {offsets = [0, 0], sizes = [1, 128], strides = [1, 1]} : vector<2x128xf32> to vector<1x128xf32>
    %91 = vector.broadcast %90 : vector<1x128xf32> to vector<16x128xf32>
    %92 = arith.mulf %64, %91 : vector<16x128xf32>
    %93 = vector.extract_strided_slice %89 {offsets = [1, 0], sizes = [1, 128], strides = [1, 1]} : vector<2x128xf32> to vector<1x128xf32>
    %94 = vector.broadcast %93 : vector<1x128xf32> to vector<16x128xf32>
    %95 = arith.addf %92, %94 : vector<16x128xf32>
    %96 = arith.addf %95, %3 : vector<16x128xf32>
    %cst_42 = arith.constant 0.000000e+00 : f32
    %97 = vector.broadcast %cst_42 : f32 to vector<16x128xf32>
    %98 = arith.maximumf %96, %97 : vector<16x128xf32>
    %c0_43 = arith.constant 0 : index
    %c0_44 = arith.constant 0 : index
    %99 = vector.load %arg9[%c0_43, %c0_44] : memref<16x128xf32, #tpu.memory_space<vmem>>, vector<16x128xf32>
    tpu.vector_store %arg9[%c0_43, %c0_44], %98 {strides = array<i32>} : memref<16x128xf32, #tpu.memory_space<vmem>>, vector<16x128xf32>,
    return
  }
}

</mosaic_0001>

<bundles_post_ra>
// kernel: basic_block_forward.1
= control target key start
LH: loop header
LB: loop body
LE: loop exit
PB: predicated region body
PF: predicated region fallthrough
CT: control target
= control target key end

     0   :  { %v1472_v1 = vmov 0.0   ;;  %vm1473_vm0 = vmmov 0   ;;  %v50_v17 = vlaneseq  ;;  %vm1474_vm5 = vmmov 1   ;;  %s1917_s1 = inlined_call_operand.vmem [shape: bf16[384,128], index: 1, kind: input, shape index: {}]   ;;  %s1918_s0 = inlined_call_operand.vmem [shape: f32[16,128], index: 0, kind: input, shape index: {}]   ;;  %s1919_s7 = inlined_call_operand.vmem [shape: f32[128,4], index: 7, kind: input, shape index: {}]   ;;  %s1920_s8 = inlined_call_operand.vmem [shape: f32[4,128], index: 8, kind: input, shape index: {}]   ;;  %s1921_s2 = inlined_call_operand.vmem [shape: bf16[384,128], index: 2, kind: input, shape index: {}]   ;;  %s1922_s3 = inlined_call_operand.vmem [shape: f32[1,4], index: 3, kind: input, shape index: {}]   ;;  %s1923_s4 = inlined_call_operand.vmem [shape: f32[1,4], index: 4, kind: input, shape index: {}]   ;;  %s1924_s5 = inlined_call_operand.vmem [shape: f32[1,4], index: 5, kind: input, shape index: {}]   ;;  %s1925_s6 = inlined_call_operand.vmem [shape: f32[1,4], index: 6, kind: input, shape index: {}]   ;;  %s1926_s9 = inlined_call_operand.vmem [shape: f32[16,128], index: 9, kind: output, shape index: {}]  }
   0x1   :  { %v1420_v0 = vld [vmem:[%s1917_s1 + $0x40] sm:$0xff]   ;;  %1247 = vmatprep.subr.bf16.mxu1 %v1472_v1  ;;  %1263 = vmatprep.mubr.msk.bf16.mxu1 %vm1473_vm0, %v1472_v1  ;;  %v1423_v4 = vld [vmem:[%s1917_s1 + $0x48] sm:$0xff]   ;;  %v1426_v7 = vld [vmem:[%s1917_s1 + $0x50] sm:$0xff]   ;;  %v1475_v46 = vmov 0.0|0.0   ;;  %vm366_vm8 = vcmask 1040384   ;;  %vm480_vm9 = vcmask 1043456  }
   0x2   :  { %v1421_v2 = vld [vmem:[%s1917_s1] sm:$0xff]   ;;  %1147 = vmatprep.subr.bf16.mxu0 %v1420_v0  ;;  %v1424_v5 = vld [vmem:[%s1917_s1 + $0x8] sm:$0xff]   ;;  %v1427_v8 = vld [vmem:[%s1917_s1 + $0x10] sm:$0xff]   ;;  %v1591_v21 = vshrl.u32 %v50_v17, 7  ;;  %vm476_vm10 = vcmask 31744  }
   0x3   :  { %v1422_v3 = vld [vmem:[%s1917_s1 + $0x80] sm:$0xff]   ;;  %1148 = vmatpush3.bf16.msra.mxu0 %v1421_v2  ;;  %v1425_v6 = vld [vmem:[%s1917_s1 + $0x88] sm:$0xff]   ;;  %v1428_v9 = vld [vmem:[%s1917_s1 + $0x90] sm:$0xff]  }
   0x4   :  { %1248 = vmatpush3.bf16.msra.mxu1 %v1422_v3  ;;  %1149 = vmatprep.subr.bf16.mxu0 %v1423_v4  ;;  %v1429_v10 = vld [vmem:[%s1917_s1 + $0x58] sm:$0xff]   ;;  %v1432_v13 = vld [vmem:[%s1917_s1 + $0x60] sm:$0xff]   ;;  %v1435_v16 = vld [vmem:[%s1917_s1 + $0x68] sm:$0xff]   ;;  %vm59_vm1 = vcmp.lt.s32.totalorder %v1591_v21, 1  ;;  %v52_v27 = vadd.s32 8, %v1591_v21  ;;  %vm68_vm2 = vcmp.lt.s32.totalorder %v1591_v21, 7 }
   0x5   :  { %1249 = vmatprep.subr.bf16.mxu1 %v1472_v1  ;;  %v1430_v11 = vld [vmem:[%s1917_s1 + $0x18] sm:$0xff]   ;;  %v1433_v14 = vld [vmem:[%s1917_s1 + $0x20] sm:$0xff]   ;;  %v1436_v18 = vld [vmem:[%s1917_s1 + $0x28] sm:$0xff]   ;;  %vm1145_vm3 = vcmp.ne.s32.totalorder %v1591_v21, 0 }
   0x6   :  { %v1431_v12 = vld [vmem:[%s1917_s1 + $0x98] sm:$0xff]   ;;  %v1434_v15 = vld [vmem:[%s1917_s1 + $0xa0] sm:$0xff]   ;;  %v1437_v19 = vld [vmem:[%s1917_s1 + $0xa8] sm:$0xff]   ;;  %vm1146_vm4 = vcmp.ne.s32.totalorder %v52_v27, 15 }
   0x7   :  { %1150 = vmatpush3.bf16.msra.mxu0 %v1424_v5  ;;  %v1438_v20 = vld [vmem:[%s1917_s1 + $0x70] sm:$0xff]   ;;  %v1441_v24 = vld [vmem:[%s1917_s1 + $0x78] sm:$0xff]   ;;  %v1606_v25 = vld [vmem:[%s1918_s0] sm:$0xff] }
   0x8   :  { %1250 = vmatpush3.bf16.msra.mxu1 %v1425_v6  ;;  %1151 = vmatprep.subr.bf16.mxu0 %v1426_v7  ;;  %v1439_v22 = vld [vmem:[%s1917_s1 + $0x30] sm:$0xff]   ;;  %v1611_v26 = vld [vmem:[%s1918_s0 + $0x8] sm:$0xff]  ;;  %v57_v28 = vrot.slane %v1606_v25, 7  ;;  %v66_v30 = vrot.slane %v1606_v25, 1  ;;  %v1442_v33 = vld [vmem:[%s1917_s1 + $0x38] sm:$0xff]  }
   0x9   :  { %1251 = vmatprep.subr.bf16.mxu1 %v1472_v1  ;;  %v1440_v23 = vld [vmem:[%s1917_s1 + $0xb0] sm:$0xff]   ;;  %v58_v29 = vrot.slane %v1611_v26, 7  ;;  %v67_v31 = vrot.slane %v1611_v26, 1  ;;  %v74_v32 = vpack.c.bf16 %v1611_v26, %v1606_v25  ;;  %v1443_v36 = vld [vmem:[%s1917_s1 + $0xb8] sm:$0xff]   ;;  %v33_v39 = vld [vmem:[%s1919_s7] sm:$0xff] }
   0xa   :  { %v34_v40 = vld [vmem:[%s1919_s7 + $0x8] sm:$0xff]  ;;  %vm1645_vm6 = vmpackc.low %vm1474_vm5, %vm1145_vm3  ;;  %v35_v47 = vld [vmem:[%s1919_s7 + $0x10] sm:$0xff] }
   0xb   :  { %1152 = vmatpush3.bf16.msra.mxu0 %v1427_v8  ;;  %v60_v34 = vsel %vm59_vm1, %v57_v28, %v58_v29  ;;  %v61_v35 = vsel %vm59_vm1, %v58_v29, %v57_v28  ;;  %v69_v37 = vsel %vm68_vm2, %v66_v30, %v67_v31  ;;  %v70_v38 = vsel %vm68_vm2, %v67_v31, %v66_v30  ;;  %vm1651_vm7 = vmpackc.low %vm1146_vm4, %vm1474_vm5  ;;  %v36_v48 = vld [vmem:[%s1919_s7 + $0x18] sm:$0xff]  ;;  %v37_v50 = vld [vmem:[%s1919_s7 + $0x20] sm:$0xff] }
   0xc   :  { %1252 = vmatpush3.bf16.msra.mxu1 %v1428_v9  ;;  %1153 = vmatprep.subr.bf16.mxu0 %v1429_v10  ;;  %v1103_v41 = vpack.c.bf16 %v60_v34, %v61_v35  ;;  %v1107_v43 = vpack.c.bf16 %v70_v38, %v69_v37  ;;  %v1649_v44 = vpack.c.bf16 %v34_v40, %v33_v39  ;;  %v38_v51 = vld [vmem:[%s1919_s7 + $0x28] sm:$0xff]  ;;  %v39_v53 = vld [vmem:[%s1919_s7 + $0x30] sm:$0xff]  ;;  %v40_v54 = vld [vmem:[%s1919_s7 + $0x38] sm:$0xff] }
   0xd   :  { %1253 = vmatprep.subr.bf16.mxu1 %v1472_v1  ;;  %300 = vmatprep.mubr.bf16.mxu0 %v74_v32  ;;  %v1668_v49 = vpack.c.bf16 %v36_v48, %v35_v47  ;;  %v1683_v52 = vpack.c.bf16 %v38_v51, %v37_v50  ;;  %v1693_v55 = vpack.c.bf16 %v40_v54, %v39_v53  ;;  %v41_v56 = vld [vmem:[%s1919_s7 + $0x40] sm:$0xff]  ;;  %v42_v57 = vld [vmem:[%s1919_s7 + $0x48] sm:$0xff]  ;;  %v43_v59 = vld [vmem:[%s1919_s7 + $0x50] sm:$0xff] }
   0xe   :  { %v1703_v58 = vpack.c.bf16 %v42_v57, %v41_v56  ;;  %v44_v60 = vld [vmem:[%s1919_s7 + $0x58] sm:$0xff]  ;;  %v45_v62 = vld [vmem:[%s1919_s7 + $0x60] sm:$0xff]  ;;  %v46_v63 = vld [vmem:[%s1919_s7 + $0x68] sm:$0xff] }
   0xf   :  { %1154 = vmatpush3.bf16.msra.mxu0 %v1430_v11  ;;  %v1713_v61 = vpack.c.bf16 %v44_v60, %v43_v59  ;;  %v1722_v0 = vpack.c.bf16 %v46_v63, %v45_v62  ;;  %v47_v2 = vld [vmem:[%s1919_s7 + $0x70] sm:$0xff]  ;;  %v48_v3 = vld [vmem:[%s1919_s7 + $0x78] sm:$0xff]  ;;  %v1753_v37 = vld [vmem:[%s1920_s8] sm:$0xf]  ;;  %v1476_v60 = vmov 1966171168  }
  0x10   :  { %1254 = vmatpush3.bf16.msra.mxu1 %v1431_v12  ;;  %1155 = vmatprep.subr.bf16.mxu0 %v1432_v13  ;;  %v1732_v4 = vpack.c.bf16 %v48_v3, %v47_v2  ;;  %v1444_v38 = vld [vmem:[%s1921_s2 + $0x40] sm:$0xff]   ;;  %v1449_v40 = vld [vmem:[%s1921_s2 + $0x88] sm:$0xff]   ;;  %v450_v62 = vunpack.c.l.s4 %v1476_v60 }
  0x11   :  { %1255 = vmatprep.subr.bf16.mxu1 %v1472_v1  ;;  %v1446_v39 = vld [vmem:[%s1921_s2 + $0x80] sm:$0xff]  }
  0x12   :  { %v1458_v47 = vld [vmem:[%s1921_s2 + $0xa0] sm:$0xff]   ;;  %v451_v63 = vunpack.c.0.s8 %v450_v62 }
  0x13   :  { %1156 = vmatpush3.bf16.msra.mxu0 %v1433_v14 }
  0x14   :  { %1256 = vmatpush3.bf16.msra.mxu1 %v1434_v15  ;;  %1157 = vmatprep.subr.bf16.mxu0 %v1435_v16  ;;  %v1781_v2 = vsub.s32 %v451_v63, %v1591_v21 }
  0x15   :  { %1257 = vmatprep.subr.bf16.mxu1 %v1472_v1 }
  0x17   :  { %1158 = vmatpush3.bf16.msra.mxu0 %v1436_v18 }
  0x18   :  { %1258 = vmatpush3.bf16.msra.mxu1 %v1437_v19  ;;  %1159 = vmatprep.subr.bf16.mxu0 %v1438_v20 }
  0x19   :  { %1259 = vmatprep.subr.bf16.mxu1 %v1472_v1 }
  0x1b   :  { %1160 = vmatpush3.bf16.msra.mxu0 %v1439_v22 }
  0x1c   :  { %1260 = vmatpush3.bf16.msra.mxu1 %v1440_v23  ;;  %1161 = vmatprep.subr.bf16.mxu0 %v1441_v24 }
  0x1d   :  { %1261 = vmatprep.subr.bf16.mxu1 %v1472_v1 }
  0x1f   :  { %1162 = vmatpush3.bf16.msra.mxu0 %v1442_v33 }
  0x20   :  { %1262 = vmatpush3.bf16.msra.mxu1 %v1443_v36  ;;  %1367 = vmatprep.subr.bf16.mxu0 %v1475_v46 }
  0x21   :  { %1302 = vmatprep.subr.mxu1 %v1472_v1 }
  0x22   :  { %1104 = vmatmul.mubr.msk.bf16.vlgmr.msra.gmra.mrb[0].mxu0 %vm1645_vm6, %v1103_v41  ;;  %v1452_v41 = vld [vmem:[%s1921_s2 + $0x90] sm:$0xff]  }
  0x23   :  { %1264 = vmatmul.mubr.msk.bf16.vlgmr.msra.gmra.mrb[0].mxu1 %vm1651_vm7, %v1107_v43  ;;  %1369 = vmatpush3.bf16.msra.mxu0 %v1649_v44  ;;  %v1455_v43 = vld [vmem:[%s1921_s2 + $0x98] sm:$0xff]  }
  0x24   :  { %1370 = vmatprep.subr.bf16.mxu0 %v1475_v46  ;;  %1299 = vmatprep.mubr.msk.f32.mxu0 %vm1473_vm0, %v1472_v1 }
  0x25   :  { %1304 = vmatprep.mubr.msk.f32.mxu1 %vm1473_vm0, %v1472_v1  ;;  %1303 = vmatpush3.msk.msra.mxu1 %vm480_vm9, %v1753_v37 }
  0x26   :  { %1197 = vmatprep.subr.bf16.mxu1 %v1444_v38  ;;  %v1466_v38 = vld [vmem:[%s1921_s2 + $0x38] sm:$0xff]  }
  0x27   :  { %1372 = vmatpush3.bf16.msra.mxu0 %v1668_v49 }
  0x28   :  { %1373 = vmatprep.subr.bf16.mxu0 %v1475_v46 }
  0x2b   :  { %1375 = vmatpush3.bf16.msra.mxu0 %v1683_v52 }
  0x2c   :  { %1376 = vmatprep.subr.bf16.mxu0 %v1475_v46 }
  0x2f   :  { %1378 = vmatpush3.bf16.msra.mxu0 %v1693_v55 }
  0x30   :  { %1379 = vmatprep.subr.bf16.mxu0 %v1475_v46 }
  0x33   :  { %1381 = vmatpush3.bf16.msra.mxu0 %v1703_v58 }
  0x34   :  { %1382 = vmatprep.subr.bf16.mxu0 %v1475_v46 }
  0x37   :  { %1384 = vmatpush3.bf16.msra.mxu0 %v1713_v61 }
  0x38   :  { %1385 = vmatprep.subr.bf16.mxu0 %v1475_v46 }
  0x3b   :  { %1387 = vmatpush3.bf16.msra.mxu0 %v1722_v0 }
  0x3c   :  { %1388 = vmatprep.subr.bf16.mxu0 %v1475_v46 }
  0x3f   :  { %1390 = vmatpush3.bf16.msra.mxu0 %v1732_v4 }
  0x40   :  { %1307 = vmatprep.subr.bf16.mxu0 %v1472_v1 }
  0xf5   :  { %v1163_v5 = vpop.f32.mrb[0].mxu0 }
  0xf6   :  { %v343_v6 = vpop.f32.mrb[0].mxu1  ;;  %v1164_v7 = vpop.f32.mrb[1].mxu0 }
  0xf7   :  { %v1165_v8 = vadd.f32 %v1164_v7, %v1163_v5  ;;  %v1265_v9 = vpop.f32.mrb[1].mxu1  ;;  %v1166_v10 = vpop.f32.mrb[2].mxu0  ;;  %v445_v7 = vld [vmem:[%s1922_s3] sm:$0x1] }
  0xf8   :  { %v346_v11 = vpop.f32.mrb[2].mxu1  ;;  %v1167_v12 = vpop.f32.mrb[3].mxu0 }
  0xf9   :  { %v1737_v13 = vadd.f32 %v1165_v8, %v343_v6  ;;  %v1168_v14 = vadd.f32 %v1167_v12, %v1166_v10  ;;  %v1266_v15 = vpop.f32.mrb[3].mxu1  ;;  %v466_v10 = vld [vmem:[%s1923_s4] sm:$0x1]  ;;  %v1792_v12 = vsub.s32 0, %v1591_v21 }
  0xfb   :  { %v1739_v16 = vadd.f32 %v1168_v14, %v346_v11  ;;  %v357_v17 = vmul.f32 %v1737_v13, %v1737_v13 }
  0xfd   :  { %v350_v18 = vadd.f32 %v1739_v16, %v1737_v13  ;;  %v358_v19 = vmul.f32 %v1739_v16, %v1739_v16 }
  0xff   :  { %v351_v20 = vrot.slane %v350_v18, 4  ;;  %v359_v22 = vadd.f32 %v358_v19, %v357_v17  ;;  %v1445_v17 = vld [vmem:[%s1921_s2] sm:$0xff]  }
 0x101   :  { %v352_v23 = vadd.f32 %v351_v20, %v350_v18  ;;  %v360_v24 = vrot.slane %v359_v22, 4  ;;  %v1447_v18 = vld [vmem:[%s1921_s2 + $0x48] sm:$0xff]  }
 0x102   :  { %v1448_v20 = vld [vmem:[%s1921_s2 + $0x8] sm:$0xff]  }
 0x103   :  { %v353_v27 = vrot.slane %v352_v23, 2  ;;  %v361_v28 = vadd.f32 %v360_v24, %v359_v22  ;;  %v1450_v22 = vld [vmem:[%s1921_s2 + $0x50] sm:$0xff]   ;;  %v1453_v24 = vld [vmem:[%s1921_s2 + $0x58] sm:$0xff]  }
 0x105   :  { %v354_v29 = vadd.f32 %v353_v27, %v352_v23  ;;  %v362_v30 = vrot.slane %v361_v28, 2  ;;  %v1451_v23 = vld [vmem:[%s1921_s2 + $0x10] sm:$0xff]   ;;  %v1454_v27 = vld [vmem:[%s1921_s2 + $0x18] sm:$0xff]  }
 0x107   :  { %v355_v31 = vrot.slane %v354_v29, 1  ;;  %v363_v32 = vadd.f32 %v362_v30, %v361_v28  ;;  %v1456_v28 = vld [vmem:[%s1921_s2 + $0x60] sm:$0xff]   ;;  %v1459_v30 = vld [vmem:[%s1921_s2 + $0x68] sm:$0xff]  }
 0x109   :  { %v364_v33 = vrot.slane %v363_v32, 1  ;;  %v356_v34 = vadd.f32 %v355_v31, %v354_v29  ;;  %v1457_v29 = vld [vmem:[%s1921_s2 + $0x20] sm:$0xff]   ;;  %v1460_v31 = vld [vmem:[%s1921_s2 + $0x28] sm:$0xff]  }
 0x10b   :  { %v365_v35 = vadd.f32 %v364_v33, %v363_v32  ;;  %v1461_v32 = vld [vmem:[%s1921_s2 + $0xa8] sm:$0xff]   ;;  %v1462_v33 = vld [vmem:[%s1921_s2 + $0x70] sm:$0xff]  }
 0x10d   :  { %v367_v36 = vsel %vm366_vm8, %v356_v34, %v365_v35  ;;  %v1463_v34 = vld [vmem:[%s1921_s2 + $0x30] sm:$0xff]  }
 0x10e   :  { %1300 = vmatmul.mubr.f32.vlgmr.msra.gmra.mrb[4].mxu0 %v367_v36  ;;  %v1464_v35 = vld [vmem:[%s1921_s2 + $0xb0] sm:$0xff]   ;;  %v1465_v36 = vld [vmem:[%s1921_s2 + $0x78] sm:$0xff]  }
 0x10f   :  { %1323 = vmatprep.mubr.msk.bf16.mxu0 %vm1473_vm0, %v1472_v1  ;;  %1308 = vmatpush3.bf16.msra.mxu0 %v1446_v39  ;;  %v1467_v39 = vld [vmem:[%s1921_s2 + $0xb8] sm:$0xff]  }
 0x110   :  { %1309 = vmatprep.subr.bf16.mxu0 %v1472_v1 }
 0x113   :  { %1310 = vmatpush3.bf16.msra.mxu0 %v1449_v40  ;;  %v562_v40 = vsub.s32 1, %v1591_v21 }
 0x114   :  { %1311 = vmatprep.subr.bf16.mxu0 %v1472_v1 }
 0x117   :  { %1312 = vmatpush3.bf16.msra.mxu0 %v1452_v41 }
 0x118   :  { %1313 = vmatprep.subr.bf16.mxu0 %v1472_v1 }
 0x11b   :  { %1314 = vmatpush3.bf16.msra.mxu0 %v1455_v43 }
 0x11c   :  { %1315 = vmatprep.subr.bf16.mxu0 %v1472_v1 }
 0x11f   :  { %1316 = vmatpush3.bf16.msra.mxu0 %v1458_v47 }
 0x120   :  { %1317 = vmatprep.subr.bf16.mxu0 %v1472_v1 }
 0x123   :  { %1318 = vmatpush3.bf16.msra.mxu0 %v1461_v32 }
 0x124   :  { %1319 = vmatprep.subr.bf16.mxu0 %v1472_v1 }
 0x127   :  { %1320 = vmatpush3.bf16.msra.mxu0 %v1464_v35 }
 0x128   :  { %1321 = vmatprep.subr.bf16.mxu0 %v1472_v1 }
 0x12b   :  { %1322 = vmatpush3.bf16.msra.mxu0 %v1467_v39 }
 0x12c   :  { %1362 = vmatprep.subr.mxu0 %v1472_v1 }
 0x1e1   :  { %v434_v48 = vpop.f32.mrb[4].mxu0 }
 0x1e2   :  { %v438_v50 = vmul.f32 0.001953125, %v434_v48  ;;  %v1301_v51 = vpop.f32.mrb[5].mxu0 }
 0x1e4   :  { %v439_v53 = vmul.f32 %v438_v50, %v438_v50 }
 0x1e6   :  { %v441_v54 = vrot.slane %v439_v53, 7 }
 0x1e8   :  { %v443_v56 = vsub.f32 %v438_v50, %v441_v54 }
 0x1ea   :  { %v444_v57 = vmax.f32 %v443_v56, 0.0 }
 0x1ec   :  { %v446_v59 = vadd.f32 1e-05, %v444_v57 }
 0x1ee   :  { %1468 = vrsqrt.f32 %v446_v59 }
 0x1f8   :  { %v1469_v3 = vpop.eup %1468 }
 0x1f9   :  { %v455_v5 = vrot.slane %v1469_v3, %v1781_v2 }
 0x1fb   :  { %v456_v6 = vcombine.high %v455_v5, %v455_v5 }
 0x1fd   :  { %v463_v8 = vrot.slane %v456_v6, %v1781_v2 }
 0x1ff   :  { %v465_v9 = vmul.f32 %v463_v8, %v445_v7 }
 0x201   :  { %v467_v11 = vmul.f32 %v465_v9, %v438_v50 }
 0x203   :  { %v468_v14 = vsub.f32 %v466_v10, %v467_v11 }
 0x205   :  { %v473_v15 = vrot.slane %v468_v14, %v1792_v12 }
 0x207   :  { %v475_v19 = vsel %vm366_vm8, %v465_v9, %v473_v15 }
 0x208   :  { %1305 = vmatmul.mubr.msk.f32.vlgmr.msra.gmra.mrb[4].mxu1 %vm476_vm10, %v475_v19 }
 0x209   :  { %1198 = vmatpush3.bf16.msra.mxu1 %v1445_v17 }
 0x20a   :  { %1199 = vmatprep.subr.bf16.mxu1 %v1447_v18 }
 0x20d   :  { %1200 = vmatpush3.bf16.msra.mxu1 %v1448_v20 }
 0x20e   :  { %1201 = vmatprep.subr.bf16.mxu1 %v1450_v22 }
 0x211   :  { %1202 = vmatpush3.bf16.msra.mxu1 %v1451_v23 }
 0x212   :  { %1203 = vmatprep.subr.bf16.mxu1 %v1453_v24 }
 0x215   :  { %1204 = vmatpush3.bf16.msra.mxu1 %v1454_v27 }
 0x216   :  { %1205 = vmatprep.subr.bf16.mxu1 %v1456_v28 }
 0x219   :  { %1206 = vmatpush3.bf16.msra.mxu1 %v1457_v29 }
 0x21a   :  { %1207 = vmatprep.subr.bf16.mxu1 %v1459_v30 }
 0x21d   :  { %1208 = vmatpush3.bf16.msra.mxu1 %v1460_v31 }
 0x21e   :  { %1209 = vmatprep.subr.bf16.mxu1 %v1462_v33 }
 0x221   :  { %1210 = vmatpush3.bf16.msra.mxu1 %v1463_v34 }
 0x222   :  { %1211 = vmatprep.subr.bf16.mxu1 %v1465_v36 }
 0x225   :  { %1212 = vmatpush3.bf16.msra.mxu1 %v1466_v38 }
 0x226   :  { %1391 = vmatprep.subr.bf16.mxu1 %v1475_v46 }
 0x2db   :  { %v550_v41 = vpop.f32.mrb[4].mxu1 }
 0x2dc   :  { %v557_v43 = vrot.slane %v550_v41, %v1792_v12  ;;  %v1306_v47 = vpop.f32.mrb[5].mxu1  ;;  %v563_v51 = vrot.slane %v550_v41, %v562_v40 }
 0x2de   :  { %v558_v48 = vmul.f32 %v557_v43, %v1737_v13  ;;  %v559_v50 = vmul.f32 %v557_v43, %v1739_v16 }
 0x2e0   :  { %v564_v53 = vadd.f32 %v563_v51, %v558_v48  ;;  %v565_v54 = vadd.f32 %v563_v51, %v559_v50  ;;  %v951_v48 = vld [vmem:[%s1924_s5] sm:$0x1] }
 0x2e2   :  { %v566_v56 = vmax.f32 %v564_v53, 0.0  ;;  %v567_v57 = vmax.f32 %v565_v54, 0.0  ;;  %v972_v53 = vld [vmem:[%s1925_s6] sm:$0x1] }
 0x2e4   :  { %v568_v59 = vrot.slane %v566_v56, 7  ;;  %v569_v60 = vrot.slane %v567_v57, 7  ;;  %v574_v62 = vrot.slane %v566_v56, 1  ;;  %v575_v63 = vrot.slane %v567_v57, 1 }
 0x2e5   :  { %v581_v3 = vpack.c.bf16 %v567_v57, %v566_v56 }
 0x2e6   :  { %v570_v5 = vsel %vm59_vm1, %v568_v59, %v569_v60  ;;  %v571_v13 = vsel %vm59_vm1, %v569_v60, %v568_v59  ;;  %v576_v16 = vsel %vm68_vm2, %v574_v62, %v575_v63  ;;  %v577_v6 = vsel %vm68_vm2, %v575_v63, %v574_v62 }
 0x2e7   :  { %807 = vmatprep.mubr.bf16.mxu1 %v581_v3  ;;  %v1137_v7 = vpack.c.bf16 %v570_v5, %v571_v13  ;;  %v1141_v8 = vpack.c.bf16 %v577_v6, %v576_v16 }
 0x2e9   :  { %1138 = vmatmul.mubr.msk.bf16.vlgmr.msra.gmra.mrb[8].mxu1 %vm1645_vm6, %v1137_v7  ;;  %1324 = vmatmul.mubr.msk.bf16.vlgmr.msra.gmra.mrb[8].mxu0 %vm1651_vm7, %v1141_v8 }
 0x2ea   :  { %1393 = vmatpush3.bf16.msra.mxu1 %v1649_v44  ;;  %1359 = vmatprep.mubr.msk.f32.mxu1 %vm1473_vm0, %v1472_v1 }
 0x2eb   :  { %1394 = vmatprep.subr.bf16.mxu1 %v1475_v46  ;;  %1363 = vmatpush3.msk.msra.mxu0 %vm480_vm9, %v1753_v37 }
 0x2ec   :  { %1364 = vmatprep.mubr.msk.f32.mxu0 %vm1473_vm0, %v1472_v1 }
 0x2ee   :  { %1396 = vmatpush3.bf16.msra.mxu1 %v1668_v49 }
 0x2ef   :  { %1397 = vmatprep.subr.bf16.mxu1 %v1475_v46 }
 0x2f2   :  { %1399 = vmatpush3.bf16.msra.mxu1 %v1683_v52 }
 0x2f3   :  { %1400 = vmatprep.subr.bf16.mxu1 %v1475_v46 }
 0x2f6   :  { %1402 = vmatpush3.bf16.msra.mxu1 %v1693_v55 }
 0x2f7   :  { %1403 = vmatprep.subr.bf16.mxu1 %v1475_v46 }
 0x2fa   :  { %1405 = vmatpush3.bf16.msra.mxu1 %v1703_v58 }
 0x2fb   :  { %1406 = vmatprep.subr.bf16.mxu1 %v1475_v46 }
 0x2fe   :  { %1408 = vmatpush3.bf16.msra.mxu1 %v1713_v61 }
 0x2ff   :  { %1409 = vmatprep.subr.bf16.mxu1 %v1475_v46 }
 0x302   :  { %1411 = vmatpush3.bf16.msra.mxu1 %v1722_v0 }
 0x303   :  { %1412 = vmatprep.subr.bf16.mxu1 %v1475_v46 }
 0x306   :  { %1414 = vmatpush3.bf16.msra.mxu1 %v1732_v4 }
 0x3bc   :  { %v1213_v1 = vpop.f32.mrb[8].mxu1  ;;  %v850_v42 = vpop.f32.mrb[8].mxu0 }
 0x3bd   :  { %v1214_v44 = vpop.f32.mrb[9].mxu1  ;;  %v1325_v45 = vpop.f32.mrb[9].mxu0 }
 0x3be   :  { %v1215_v49 = vadd.f32 %v1214_v44, %v1213_v1  ;;  %v1216_v52 = vpop.f32.mrb[10].mxu1  ;;  %v853_v55 = vpop.f32.mrb[10].mxu0 }
 0x3bf   :  { %v1217_v58 = vpop.f32.mrb[11].mxu1  ;;  %v1326_v37 = vpop.f32.mrb[11].mxu0 }
 0x3c0   :  { %v851_v9 = vadd.f32 %v1215_v49, %v850_v42  ;;  %v1218_v10 = vadd.f32 %v1217_v58, %v1216_v52 }
 0x3c2   :  { %v854_v61 = vadd.f32 %v1218_v10, %v853_v55  ;;  %v864_v11 = vmul.f32 %v851_v9, %v851_v9 }
 0x3c4   :  { %v857_v14 = vadd.f32 %v854_v61, %v851_v9  ;;  %v865_v15 = vmul.f32 %v854_v61, %v854_v61 }
 0x3c6   :  { %v858_v0 = vrot.slane %v857_v14, 4  ;;  %v866_v17 = vadd.f32 %v865_v15, %v864_v11 }
 0x3c8   :  { %v859_v46 = vadd.f32 %v858_v0, %v857_v14  ;;  %v867_v18 = vrot.slane %v866_v17, 4 }
 0x3ca   :  { %v860_v4 = vrot.slane %v859_v46, 2  ;;  %v868_v19 = vadd.f32 %v867_v18, %v866_v17 }
 0x3cc   :  { %v861_v20 = vadd.f32 %v860_v4, %v859_v46  ;;  %v869_v22 = vrot.slane %v868_v19, 2 }
 0x3ce   :  { %v862_v23 = vrot.slane %v861_v20, 1  ;;  %v870_v24 = vadd.f32 %v869_v22, %v868_v19 }
 0x3d0   :  { %v871_v27 = vrot.slane %v870_v24, 1  ;;  %v863_v28 = vadd.f32 %v862_v23, %v861_v20 }
 0x3d2   :  { %v872_v29 = vadd.f32 %v871_v27, %v870_v24 }
 0x3d4   :  { %v873_v30 = vsel %vm366_vm8, %v863_v28, %v872_v29 }
 0x3d5   :  { %1360 = vmatmul.mubr.f32.vlgmr.msra.gmra.mrb[6].mxu1 %v873_v30 }
 0x4a8   :  { %v940_v31 = vpop.f32.mrb[6].mxu1 }
 0x4a9   :  { %v944_v32 = vmul.f32 0.001953125, %v940_v31  ;;  %v1361_v33 = vpop.f32.mrb[7].mxu1 }
 0x4ab   :  { %v945_v34 = vmul.f32 %v944_v32, %v944_v32 }
 0x4ad   :  { %v947_v35 = vrot.slane %v945_v34, 7 }
 0x4af   :  { %v949_v36 = vsub.f32 %v944_v32, %v947_v35 }
 0x4b1   :  { %v950_v38 = vmax.f32 %v949_v36, 0.0 }
 0x4b3   :  { %v952_v39 = vadd.f32 1e-05, %v950_v38 }
 0x4b5   :  { %1470 = vrsqrt.f32 %v952_v39 }
 0x4bf   :  { %v1471_v41 = vpop.eup %1470 }
 0x4c0   :  { %v961_v43 = vrot.slane %v1471_v41, %v1781_v2 }
 0x4c2   :  { %v962_v47 = vcombine.high %v961_v43, %v961_v43 }
 0x4c4   :  { %v969_v50 = vrot.slane %v962_v47, %v1781_v2 }
 0x4c6   :  { %v971_v51 = vmul.f32 %v969_v50, %v951_v48 }
 0x4c8   :  { %v973_v54 = vmul.f32 %v971_v51, %v944_v32 }
 0x4ca   :  { %v974_v56 = vsub.f32 %v972_v53, %v973_v54 }
 0x4cc   :  { %v979_v57 = vrot.slane %v974_v56, %v1792_v12 }
 0x4ce   :  { %v981_v59 = vsel %vm366_vm8, %v971_v51, %v979_v57 }
 0x4cf   :  { %1365 = vmatmul.mubr.msk.f32.vlgmr.msra.gmra.mrb[6].mxu0 %vm476_vm10, %v981_v59 }
 0x5a2   :  { %v1051_v60 = vpop.f32.mrb[6].mxu0 }
 0x5a3   :  { %v1058_v62 = vrot.slane %v1051_v60, %v1792_v12  ;;  %v1366_v63 = vpop.f32.mrb[7].mxu0  ;;  %v1064_v2 = vrot.slane %v1051_v60, %v562_v40 }
 0x5a5   :  { %v1059_v3 = vmul.f32 %v1058_v62, %v851_v9  ;;  %v1060_v5 = vmul.f32 %v1058_v62, %v854_v61 }
 0x5a7   :  { %v1065_v13 = vadd.f32 %v1064_v2, %v1059_v3  ;;  %v1066_v16 = vadd.f32 %v1064_v2, %v1060_v5 }
 0x5a9   :  { %v1067_v6 = vadd.f32 %v1065_v13, %v1606_v25  ;;  %v1068_v7 = vadd.f32 %v1066_v16, %v1611_v26 }
 0x5ab   :  { %v1069_v8 = vmax.f32 %v1067_v6, 0.0  ;;  %v1070_v1 = vmax.f32 %v1068_v7, 0.0 }
 0x5ad   :  { %1071 = vst [vmem:[%s1926_s9] sm:$0xff] %v1069_v8  ;;  %1072 = vst [vmem:[%s1926_s9 + $0x8] sm:$0xff] %v1070_v1 }

</bundles_post_ra>
